<compile_context>
chip_gen: v5e
topology: v5e:2x2
jax: 0.10.0
libtpu: 0.0.40
codegen_flags: <defaults>
</compile_context>

<pallas_src>
import jax
import jax.numpy as jnp
from jax.experimental import pallas as pl
from jax.experimental.pallas import tpu as pltpu

_LANE = 128
_SUBLANE_F32 = 8


def _round_up(n: int, m: int) -> int:
    return ((n + m - 1) // m) * m


def _vmem_budget_bytes(frac: float = 0.75) -> int:
    """~75-85% of physical VMEM; leaves headroom for compiler temporaries."""
    try:
        cap = pltpu.get_tpu_info().vmem_capacity_bytes
    except Exception:
        cap = 64 * 1024 * 1024  # conservative: v7x has 64 MiB/TC, v5e/v6e 128 MiB
    return int(cap * frac)


def _footprint_bytes(tm, th, tn, d_in, out_itemsize):
    """VMEM back-of-envelope for one grid step (includes the f32 hidden tile
    and its bf16 cast copy, which the old version forgot to budget)."""
    x_b = 2 * tm * d_in * 4          # double-buffered f32 x tile
    w1_b = 2 * d_in * th * 2         # bf16 W1 tile (conservatively 2 buffers)
    b1_b = 2 * th * 4
    w2_b = 2 * th * tn * 2
    b2_b = 2 * tn * 4
    out_b = 2 * tm * tn * out_itemsize
    acc_b = tm * tn * 4              # f32 accumulator scratch
    h_b = tm * th * (4 + 2)          # f32 hidden activation + bf16 cast copy
    return x_b + w1_b + b1_b + w2_b + b2_b + out_b + acc_b + h_b


def _block_spec(shape, index_map, *, single_buffer=False):
    """BlockSpec, single-buffered when the block is constant over the grid."""
    if single_buffer:
        try:
            return pl.BlockSpec(shape, index_map, pipeline_mode=pl.Buffered(1))
        except Exception:
            pass  # older JAX without pipeline_mode / Buffered -> default 2 buffers
    return pl.BlockSpec(shape, index_map)


def mlp_kernel(x_ref, w1_ref, b1_ref, w2_ref, b2_ref, o_ref, acc_ref):
    k = pl.program_id(2)

    @pl.when(k == 0)
    def _init():
        acc_ref[...] = jnp.zeros_like(acc_ref)

    # bf16 MXU operands, f32 accumulation; bias-add + ReLU in f32 (no bf16 VPU work).
    x = x_ref[...].astype(w1_ref.dtype)
    h = jnp.dot(x, w1_ref[...], preferred_element_type=jnp.float32)
    h = jnp.maximum(h + b1_ref[...], 0.0)
    acc_ref[...] += jnp.dot(h.astype(w2_ref.dtype), w2_ref[...],
                            preferred_element_type=jnp.float32)

    @pl.when(k == pl.num_programs(2) - 1)
    def _finalize():
        o_ref[...] = (acc_ref[...] + b2_ref[...]).astype(o_ref.dtype)


def prepare_mlp_params(w1, b1, w2, b2, *, compute_dtype=jnp.bfloat16,
                       max_tile=1024, vmem_frac=0.75):
    """One-time weight prep: pad hidden dim, cast to bf16, pick feature tiles.

    Hoisted out of the forward path so steady-state calls do not re-read /
    re-write the weight matrices in XLA.
    """
    d_in, d_hid = w1.shape
    d_out = w2.shape[1]
    budget = _vmem_budget_bytes(vmem_frac)

    # Output-feature tile: full D_out when small (no lane padding, no slice
    # pass); 256 for large D_out (fills the 256-wide MXU on v6e/v7x).
    tn = d_out if d_out <= 256 else 256

    # Hidden (reduction) tile: fully resident if it fits the VMEM budget at the
    # largest batch tile, otherwise halve (128-aligned) until it does.  This is
    # what keeps large models inside v7x's 64 MiB/TC.
    d_hid_p = _round_up(d_hid, _LANE)
    th = d_hid_p
    while th > 512 and _footprint_bytes(max_tile, th, tn, d_in, 4) > budget:
        th = _round_up(th // 2, _LANE)
    # Pad the hidden dim up to a multiple of th so the reduction tiling is exact
    # (zero-padded hidden columns give relu(0+0)=0 and hit zeroed W2 rows).
    d_hid_p = _round_up(d_hid_p, th)

    w1_c = jnp.pad(w1, ((0, 0), (0, d_hid_p - d_hid))).astype(compute_dtype)
    b1_c = jnp.pad(jnp.reshape(b1, (1, -1)),
                   ((0, 0), (0, d_hid_p - d_hid))).astype(jnp.float32)
    w2_c = jnp.pad(w2, ((0, d_hid_p - d_hid), (0, 0))).astype(compute_dtype)
    b2_c = jnp.reshape(b2, (1, -1)).astype(jnp.float32)

    return dict(w1=w1_c, b1=b1_c, w2=w2_c, b2=b2_c,
                d_in=d_in, d_hid_p=d_hid_p, d_out=d_out,
                th=th, tn=tn, budget=budget, max_tile=max_tile)


def mlp_forward(x, params, *, out_dtype=None):
    """y = relu(x @ W1 + b1) @ W2 + b2 using pre-prepared (padded bf16) params."""
    B, d_in = x.shape
    assert d_in == params["d_in"], "input feature dim mismatch"
    d_hid_p, d_out = params["d_hid_p"], params["d_out"]
    th, tn = params["th"], params["tn"]
    budget, max_tile = params["budget"], params["max_tile"]
    out_dtype = x.dtype if out_dtype is None else jnp.dtype(out_dtype)
    out_itemsize = jnp.dtype(out_dtype).itemsize

    # Batch tile: sublane granularity only (8 rows for the f32 LHS); the MXU
    # streams M row-by-row, no 128-row fill needed.  Shrink to fit VMEM.
    tm = min(max_tile, _round_up(B, _SUBLANE_F32))
    while tm > _SUBLANE_F32 and _footprint_bytes(tm, th, tn, d_in, out_itemsize) > budget:
        tm = _round_up(max(tm // 2, _SUBLANE_F32), _SUBLANE_F32)

    grid_m = pl.cdiv(B, tm)          # ragged last batch tile is masked by Pallas
    grid_n = pl.cdiv(d_out, tn)
    grid_k = d_hid_p // th           # exact: d_hid_p padded to a multiple of th

    # TODO(synk): when grid_m * grid_n == 1 on v7x, split tm (or tn at >=256)
    # so both TensorCores receive a parallel grid point.

    w1_c, b1_c, w2_c, b2_c = params["w1"], params["b1"], params["w2"], params["b2"]

    flops = 2 * grid_m * tm * (d_in * d_hid_p + d_hid_p * grid_n * tn)
    bytes_accessed = int(B * d_in * jnp.dtype(x.dtype).itemsize
                         + w1_c.size * w1_c.dtype.itemsize
                         + w2_c.size * w2_c.dtype.itemsize
                         + (b1_c.size + b2_c.size) * 4
                         + B * d_out * out_itemsize)

    in_specs = [
        pl.BlockSpec((tm, d_in), lambda i, j, k: (i, 0)),                      # x tile (f32)
        _block_spec((d_in, th), lambda i, j, k: (0, k),
                    single_buffer=(grid_k == 1)),                              # W1
        _block_spec((1, th), lambda i, j, k: (0, k),
                    single_buffer=(grid_k == 1)),                              # b1
        _block_spec((th, tn), lambda i, j, k: (k, j),
                    single_buffer=(grid_k == 1 and grid_n == 1)),              # W2
        _block_spec((1, tn), lambda i, j, k: (0, j),
                    single_buffer=(grid_n == 1)),                              # b2
    ]

    out = pl.pallas_call(
        mlp_kernel,
        out_shape=jax.ShapeDtypeStruct((B, d_out), out_dtype),
        grid_spec=pltpu.PrefetchScalarGridSpec(
            num_scalar_prefetch=0,
            grid=(grid_m, grid_n, grid_k),
            in_specs=in_specs,
            out_specs=pl.BlockSpec((tm, tn), lambda i, j, k: (i, j)),
            scratch_shapes=[pltpu.VMEM((tm, tn), jnp.float32)],
        ),
        compiler_params=pltpu.CompilerParams(
            dimension_semantics=("parallel", "parallel", "arbitrary"),
            vmem_limit_bytes=budget),
        cost_estimate=pl.CostEstimate(
            flops=flops, transcendentals=0, bytes_accessed=bytes_accessed),
    )(x, w1_c, b1_c, w2_c, b2_c)

    return out


if __name__ == "__main__":
    # TestModel(input_dim, output_dim): Linear(D, 4D) -> ReLU -> Linear(4D, out)
    input_dim = 32
    output_dim = 32
    hidden_dim = input_dim * 4
    batch = 8

    key = jax.random.PRNGKey(0)
    kx, k1, kb1, k2, kb2 = jax.random.split(key, 5)

    x = jax.random.normal(kx, (batch, input_dim), dtype=jnp.float32)

    # Deterministic PyTorch-Linear-style init: U(-1/sqrt(fan_in), 1/sqrt(fan_in)).
    bound1 = 1.0 / (input_dim ** 0.5)
    w1 = jax.random.uniform(k1, (input_dim, hidden_dim), jnp.float32, -bound1, bound1)
    b1 = jax.random.uniform(kb1, (hidden_dim,), jnp.float32, -bound1, bound1)
    bound2 = 1.0 / (hidden_dim ** 0.5)
    w2 = jax.random.uniform(k2, (hidden_dim, output_dim), jnp.float32, -bound2, bound2)
    b2 = jax.random.uniform(kb2, (output_dim,), jnp.float32, -bound2, bound2)

    # One-time weight prep (hoisted out of the forward path).
    params = prepare_mlp_params(w1, b1, w2, b2)

    out = mlp_forward(x, params)
    out = jax.block_until_ready(out)
    assert out.shape == (batch, output_dim)

    # Reference with the same bf16 MXU casts as the kernel (tight tolerance).
    xb = x.astype(jnp.bfloat16)
    w1b = w1.astype(jnp.bfloat16)
    w2b = w2.astype(jnp.bfloat16)
    h_ref = jnp.maximum(
        jnp.dot(xb, w1b, preferred_element_type=jnp.float32) + b1, 0.0)
    ref_bf16 = jnp.dot(h_ref.astype(jnp.bfloat16), w2b,
                       preferred_element_type=jnp.float32) + b2
    assert jnp.allclose(out, ref_bf16, atol=1e-3, rtol=1e-3), \
        "mismatch vs bf16-matched reference"

    # Loose sanity check vs the pure-f32 reference (bf16 rounding error budget).
    ref_f32 = jnp.maximum(x @ w1 + b1, 0.0) @ w2 + b2
    assert jnp.allclose(out, ref_f32, atol=5e-2, rtol=5e-2), \
        "mismatch vs f32 reference"

    print("KERNEL_OK")
</pallas_src>

<mosaic_0001>
module attributes {stable_mosaic.version = 11 : i64} {
  func.func @mlp_kernel(%arg0: i32, %arg1: i32, %arg2: i32, %arg3: memref<8x32xf32, #tpu.memory_space<vmem>>, %arg4: memref<32x128xbf16, #tpu.memory_space<vmem>>, %arg5: memref<1x128xf32, #tpu.memory_space<vmem>>, %arg6: memref<128x32xbf16, #tpu.memory_space<vmem>>, %arg7: memref<1x32xf32, #tpu.memory_space<vmem>>, %arg8: memref<8x32xf32, #tpu.memory_space<vmem>>, %arg9: memref<8x32xf32, #tpu.memory_space<vmem>>) attributes {dimension_semantics = [#tpu.dimension_semantics<parallel>, #tpu.dimension_semantics<parallel>, #tpu.dimension_semantics<arbitrary>], iteration_bounds = array<i64: 1, 1, 1>, scalar_prefetch = 0 : i64, scratch_operands = 1 : i64, tpu.core_type = #tpu.core_type<tc>, window_params = [{transform_indices = @transform_0, window_bounds = array<i64: 8, 32>}, {pipeline_mode = #tpu.pipeline_mode<synchronous>, transform_indices = @transform_1, window_bounds = array<i64: 32, 128>}, {pipeline_mode = #tpu.pipeline_mode<synchronous>, transform_indices = @transform_2, window_bounds = array<i64: 1, 128>}, {pipeline_mode = #tpu.pipeline_mode<synchronous>, transform_indices = @transform_3, window_bounds = array<i64: 128, 32>}, {pipeline_mode = #tpu.pipeline_mode<synchronous>, transform_indices = @transform_4, window_bounds = array<i64: 1, 32>}, {transform_indices = @transform_5, window_bounds = array<i64: 8, 32>}]} {
    %c0_i32 = arith.constant 0 : i32
    %0 = arith.cmpi eq, %arg2, %c0_i32 : i32
    %1 = arith.extui %0 : i1 to i32
    %c0_i32_0 = arith.constant 0 : i32
    %2 = arith.cmpi ne, %1, %c0_i32_0 : i32
    scf.if %2 {
      %cst_16 = arith.constant 0.000000e+00 : f32
      %21 = vector.broadcast %cst_16 : f32 to vector<8x32xf32>
      %c0_17 = arith.constant 0 : index
      %c0_18 = arith.constant 0 : index
      %22 = vector.load %arg9[%c0_17, %c0_18] : memref<8x32xf32, #tpu.memory_space<vmem>>, vector<8x32xf32>
      tpu.vector_store %arg9[%c0_17, %c0_18], %21 {strides = array<i32>} : memref<8x32xf32, #tpu.memory_space<vmem>>, vector<8x32xf32>,
    } else {
    }
    %c0 = arith.constant 0 : index
    %c0_1 = arith.constant 0 : index
    %3 = vector.load %arg3[%c0, %c0_1] : memref<8x32xf32, #tpu.memory_space<vmem>>, vector<8x32xf32>
    %4 = arith.truncf %3 : vector<8x32xf32> to vector<8x32xbf16>
    %c0_2 = arith.constant 0 : index
    %c0_3 = arith.constant 0 : index
    %5 = vector.load %arg4[%c0_2, %c0_3] : memref<32x128xbf16, #tpu.memory_space<vmem>>, vector<32x128xbf16>
    %cst = arith.constant dense<0.000000e+00> : vector<8x128xf32>
    %6 = tpu.matmul %4, %5, %cst {dimension_numbers = #tpu.dot_dimension_numbers<[1], [0], [0], [1], [0, 0, 1, 1], [], []>} : vector<8x32xbf16>, vector<32x128xbf16>, vector<8x128xf32> -> vector<8x128xf32>
    %c0_4 = arith.constant 0 : index
    %c0_5 = arith.constant 0 : index
    %7 = vector.load %arg5[%c0_4, %c0_5] : memref<1x128xf32, #tpu.memory_space<vmem>>, vector<1x128xf32>
    %8 = vector.broadcast %7 : vector<1x128xf32> to vector<8x128xf32>
    %9 = arith.addf %6, %8 : vector<8x128xf32>
    %cst_6 = arith.constant 0.000000e+00 : f32
    %10 = vector.broadcast %cst_6 : f32 to vector<8x128xf32>
    %11 = arith.maximumf %9, %10 : vector<8x128xf32>
    %c0_7 = arith.constant 0 : index
    %c0_8 = arith.constant 0 : index
    %12 = vector.load %arg9[%c0_7, %c0_8] : memref<8x32xf32, #tpu.memory_space<vmem>>, vector<8x32xf32>
    %13 = arith.truncf %11 : vector<8x128xf32> to vector<8x128xbf16>
    %c0_9 = arith.constant 0 : index
    %c0_10 = arith.constant 0 : index
    %14 = vector.load %arg6[%c0_9, %c0_10] : memref<128x32xbf16, #tpu.memory_space<vmem>>, vector<128x32xbf16>
    %cst_11 = arith.constant dense<0.000000e+00> : vector<8x32xf32>
    %15 = tpu.matmul %13, %14, %cst_11 {dimension_numbers = #tpu.dot_dimension_numbers<[1], [0], [0], [1], [0, 0, 1, 1], [], []>} : vector<8x128xbf16>, vector<128x32xbf16>, vector<8x32xf32> -> vector<8x32xf32>
    %16 = arith.addf %12, %15 : vector<8x32xf32>
    %c0_12 = arith.constant 0 : index
    %c0_13 = arith.constant 0 : index
    %17 = vector.load %arg9[%c0_12, %c0_13] : memref<8x32xf32, #tpu.memory_space<vmem>>, vector<8x32xf32>
    tpu.vector_store %arg9[%c0_12, %c0_13], %16 {strides = array<i32>} : memref<8x32xf32, #tpu.memory_space<vmem>>, vector<8x32xf32>,
    %c0_i32_14 = arith.constant 0 : i32
    %18 = arith.cmpi eq, %arg2, %c0_i32_14 : i32
    %19 = arith.extui %18 : i1 to i32
    %c0_i32_15 = arith.constant 0 : i32
    %20 = arith.cmpi ne, %19, %c0_i32_15 : i32
    scf.if %20 {
      %c0_16 = arith.constant 0 : index
      %c0_17 = arith.constant 0 : index
      %21 = vector.load %arg9[%c0_16, %c0_17] : memref<8x32xf32, #tpu.memory_space<vmem>>, vector<8x32xf32>
      %c0_18 = arith.constant 0 : index
      %c0_19 = arith.constant 0 : index
      %22 = vector.load %arg7[%c0_18, %c0_19] : memref<1x32xf32, #tpu.memory_space<vmem>>, vector<1x32xf32>
      %23 = vector.broadcast %22 : vector<1x32xf32> to vector<8x32xf32>
      %24 = arith.addf %21, %23 : vector<8x32xf32>
      %c0_20 = arith.constant 0 : index
      %c0_21 = arith.constant 0 : index
      %25 = vector.load %arg8[%c0_20, %c0_21] : memref<8x32xf32, #tpu.memory_space<vmem>>, vector<8x32xf32>
      tpu.vector_store %arg8[%c0_20, %c0_21], %24 {strides = array<i32>} : memref<8x32xf32, #tpu.memory_space<vmem>>, vector<8x32xf32>,
    } else {
    }
    return
  }
  func.func @transform_0(%arg0: i32, %arg1: i32, %arg2: i32) -> (i32, i32) {
    %c0_i32 = arith.constant 0 : i32
    %c0_i32_0 = arith.constant 0 : i32
    return %arg0, %c0_i32 : i32, i32
  }
  func.func @transform_1(%arg0: i32, %arg1: i32, %arg2: i32) -> (i32, i32) {
    %c0_i32 = arith.constant 0 : i32
    %c0_i32_0 = arith.constant 0 : i32
    return %c0_i32, %arg2 : i32, i32
  }
  func.func @transform_2(%arg0: i32, %arg1: i32, %arg2: i32) -> (i32, i32) {
    %c0_i32 = arith.constant 0 : i32
    %c0_i32_0 = arith.constant 0 : i32
    return %c0_i32, %arg2 : i32, i32
  }
  func.func @transform_3(%arg0: i32, %arg1: i32, %arg2: i32) -> (i32, i32) {
    %c0_i32 = arith.constant 0 : i32
    return %arg2, %arg1 : i32, i32
  }
  func.func @transform_4(%arg0: i32, %arg1: i32, %arg2: i32) -> (i32, i32) {
    %c0_i32 = arith.constant 0 : i32
    %c0_i32_0 = arith.constant 0 : i32
    return %c0_i32, %arg1 : i32, i32
  }
  func.func @transform_5(%arg0: i32, %arg1: i32, %arg2: i32) -> (i32, i32) {
    %c0_i32 = arith.constant 0 : i32
    return %arg0, %arg1 : i32, i32
  }
}

</mosaic_0001>

<bundles_post_ra>
// kernel: tpu_custom_call.1
= control target key start
LH: loop header
LB: loop body
LE: loop exit
PB: predicated region body
PF: predicated region fallthrough
CT: control target
= control target key end

     0   :  { %vm26_vm0 = vcmask 261120   ;;  %v256_v1 = vmov 0.0   ;;  %s334_s0 = inlined_call_operand.vmem [shape: f32[8,32], index: 0, kind: input, shape index: {}]   ;;  %s335_s1 = inlined_call_operand.vmem [shape: bf16[32,128], index: 1, kind: input, shape index: {}]   ;;  %s336_s2 = inlined_call_operand.vmem [shape: f32[1,128], index: 2, kind: input, shape index: {}]   ;;  %s337_s3 = inlined_call_operand.vmem [shape: bf16[128,32], index: 3, kind: input, shape index: {}]   ;;  %s338_s4 = inlined_call_operand.vmem [shape: f32[1,32], index: 4, kind: input, shape index: {}]   ;;  %s339_s5 = inlined_call_operand.hbm [shape: f32[8,32], index: 5, kind: output, shape index: {}]  }
   0x1   :  { %v217_v0 = vld [vmem:[%s335_s1 + $0x8] sm:$0xff]  ;;  %27 = vst.msk [vmem:[#allocation2] sm:$0xff] %vm26_vm0, %v256_v1  ;;  %v225_v2 = vld [vmem:[%s337_s3 + $0x38] sm:$0xff]  ;;  %v216_v3 = vld [vmem:[%s335_s1] sm:$0xff] }
   0x2   :  { %60 = vmatpush.bf16.msra.mxu0 %v217_v0  ;;  %v28_v4 = vld [vmem:[%s334_s0] sm:$0xff]  ;;  %134 = vmatpush.bf16.msra.mxu1 %v225_v2  ;;  %v224_v5 = vld [vmem:[%s337_s3 + $0x30] sm:$0xff] }
   0x3   :  { %10 = vsyncpa [#allocation4], 0  ;;  %v29_v6 = vpack.c.bf16 %v28_v4, %v28_v4  ;;  %v223_v7 = vld [vmem:[%s337_s3 + $0x28] sm:$0xff]  ;;  %v222_v8 = vld [vmem:[%s337_s3 + $0x20] sm:$0xff]  ;;  %s166_s19 = sshll.u32 %s339_s5, 4  ;;  %s167_s19 = int_to_ptr.hbm [resolvable:$true] %s166_s19 }
   0x4   :  { %v221_v9 = vld [vmem:[%s337_s3 + $0x18] sm:$0xff]  ;;  %v220_v10 = vld [vmem:[%s337_s3 + $0x10] sm:$0xff]  ;;  %v219_v11 = vld [vmem:[%s337_s3 + $0x8] sm:$0xff] }
   0x5   :  { %v218_v12 = vld [vmem:[%s337_s3] sm:$0xff]  ;;  %s257_s3 = smov [#allocation3]  }
   0x6   :  { %61 = vmatpush.bf16.msra.mxu0 %v216_v3  ;;  %135 = vmatpush.bf16.msra.mxu1 %v224_v5  ;;  %v228_v13 = vld [vmem:[%s336_s2] ss:$0 sm:$0xff]  ;;  %s164_s17 = sshll.u32 %s257_s3, 4  ;;  %s165_s17 = int_to_ptr.vmem [resolvable:$true] %s164_s17 }
   0x7   :  { %v229_v22 = vld [vmem:[%s338_s4] ss:$0 sm:$0xff] }
   0x8   :  { %v68_v19 = vld [vmem:[#allocation2] sm:$0xff] }
   0x9   :  { %183 = vmatmul.msk.bf16.vlgmr.msra.gmra.mxu0 %vm26_vm0, %v29_v6 }
   0xa   :  { %136 = vmatpush.bf16.msra.mxu1 %v223_v7 }
   0xe   :  { %137 = vmatpush.bf16.msra.mxu1 %v222_v8 }
  0x12   :  { %138 = vmatpush.bf16.msra.mxu1 %v221_v9 }
  0x16   :  { %139 = vmatpush.bf16.msra.mxu1 %v220_v10 }
  0x1a   :  { %140 = vmatpush.bf16.msra.mxu1 %v219_v11 }
  0x1e   :  { %141 = vmatpush.bf16.msra.mxu1 %v218_v12 }
  0x86   :  { %v63_v14 = vpop.f32.mrf.mxu0 }
  0x87   :  { %v64_v15 = vadd.f32 %v228_v13, %v63_v14 }
  0x89   :  { %v67_v16 = vmax.f32 %v64_v15, 0.0 }
  0x8b   :  { %v69_v17 = vpack.c.bf16 %v67_v16, %v67_v16 }
  0x8d   :  { %142 = vmatmul.bf16.vlgmr.msra.gmra.mxu1 %v69_v17 }
  0x8e   :  { %v65_v18 = vpop.f32.mrf.mxu0 }
 0x10a   :  { %v143_v20 = vpop.f32.mrf.mxu1 }
 0x10b   :  { %v147_v21 = vadd.f32 %v143_v20, %v68_v19 }
 0x10d   :  { %148 = vst.msk [vmem:[#allocation2] sm:$0xff] %vm26_vm0, %v147_v21 }
 0x112   :  { %v145_v23 = vpop.f32.mrf.mxu1 }
 0x114   :  { %v152_v24 = vld [vmem:[#allocation2] sm:$0xff] }
 0x115   :  { %v157_v25 = vadd.f32 %v229_v22, %v152_v24 }
 0x117   :  { %158 = vst.msk [vmem:[#allocation3] sm:$0xff] %vm26_vm0, %v157_v25 }
 0x118   :  { %169 = dma.vmem_to_hbm [thread:$0]  %s165_s17, 128, %s167_s19, [#allocation4]  }
 0x119   :  { %254 = dma.done.wait [#allocation4], 128  }
 0x11a   :  { %255 = vsyncadd [#allocation4], 4294967168 }
 0x11b   :  { %174 = vsyncpa [#allocation4], 1 }

</bundles_post_ra>
